<compile_context>
chip_gen: v5e
topology: v5e:2x2
jax: 0.10.0
libtpu: 0.0.40
codegen_flags: <defaults>
</compile_context>

<pallas_src>
import jax
import jax.numpy as jnp
from jax.experimental import pallas as pl
from jax.experimental.pallas import tpu as pltpu


def _round_up(a, b):
    return (a + b - 1) // b * b


def _patch_embed_kernel(p_ref, w_ref, b_ref, o_ref):
    # p_ref: (TM, Kp) compute dtype, w_ref: (Kp, Hp) compute dtype,
    # b_ref: (1, Hp) f32, o_ref: (TM, Hp) out dtype.  f32 accumulate on MXU.
    acc = jnp.dot(p_ref[...], w_ref[...], preferred_element_type=jnp.float32)
    o_ref[...] = (acc + b_ref[...]).astype(o_ref.dtype)


def patch_embed(x, weight, bias, patch_size, *, tile_m=1024,
                compute_dtype=jnp.bfloat16, out_dtype=None):
    """x: (B, C, H, W); weight: (hid, C, P, P); bias: (hid,) -> (B, N, hid)."""
    B, C, H, W = x.shape
    P = patch_size
    assert H % P == 0 and W % P == 0
    hid = weight.shape[0]
    assert weight.shape == (hid, C, P, P) and bias.shape == (hid,)
    nh, nw = H // P, W // P
    N = nh * nw
    K = C * P * P
    M = B * N
    out_dtype = x.dtype if out_dtype is None else out_dtype

    # Lane-dense padding: contraction dim K and output dim hid to 128 lanes.
    K_pad = _round_up(K, 128)
    hid_pad = _round_up(hid, 128)

    # --- glue (plain JAX): per-patch gather, one chained expression ---------
    # Cast first so the transpose moves bf16 bytes; reshape+transpose+pad form
    # a single XLA copy fusion, and allow_input_fusion (below) asks XLA to pull
    # it into the pallas_call operand DMA when possible.
    patches = (
        x.astype(compute_dtype)
        .reshape(B, C, nh, P, nw, P)
        .transpose(0, 2, 4, 1, 3, 5)            # (B, nh, nw, C, P, P)
        .reshape(M, K)
    )

    # M tiling.  16-row alignment (bf16 sublane packing).  For modest M, split
    # into two balanced tiles so the "parallel" axis covers both TCs on v7x.
    if M >= 2 * tile_m:
        TM = tile_m
    else:
        TM = _round_up(max((M + 1) // 2, 16), 16)
    M_arr = max(M, TM)                  # only pad rows if one tile exceeds M
    grid_m = pl.cdiv(M_arr, TM)         # ragged last tile handled by masking

    pad_rows = M_arr - M
    if pad_rows or K_pad != K:
        patches = jnp.pad(patches, ((0, pad_rows), (0, K_pad - K)))

    w_mat = weight.reshape(hid, K).T.astype(compute_dtype)       # (K, hid)
    if K_pad != K or hid_pad != hid:
        w_mat = jnp.pad(w_mat, ((0, K_pad - K), (0, hid_pad - hid)))
    b_mat = jnp.pad(bias.astype(jnp.float32), (0, hid_pad - hid)).reshape(1, hid_pad)

    cdt_bytes = jnp.dtype(compute_dtype).itemsize
    out_bytes = jnp.dtype(out_dtype).itemsize
    bytes_accessed = (
        M_arr * K_pad * cdt_bytes            # patches
        + K_pad * hid_pad * cdt_bytes        # weight (VMEM-resident)
        + hid_pad * 4                        # bias
        + M_arr * hid_pad * out_bytes        # output
    )

    # Double-buffered VMEM working set; raise the scoped limit only when the
    # smallest default (v5e: 16 MiB) would be tight.  Cap below v7x's 64 MiB.
    vmem_need = (2 * TM * K_pad * cdt_bytes
                 + 2 * TM * hid_pad * out_bytes
                 + 2 * K_pad * hid_pad * cdt_bytes
                 + 2 * hid_pad * 4)
    cp_kwargs = dict(
        dimension_semantics=("parallel",),           # shard M over TCs (v7x)
        allow_input_fusion=[True, False, False],     # fuse patch gather if possible
    )
    if vmem_need > 10 * (1 << 20):
        cp_kwargs["vmem_limit_bytes"] = min(int(1.5 * vmem_need) + (2 << 20),
                                            48 * (1 << 20))

    out = pl.pallas_call(
        _patch_embed_kernel,
        out_shape=jax.ShapeDtypeStruct((M_arr, hid_pad), out_dtype),
        grid_spec=pl.GridSpec(
            grid=(grid_m,),
            in_specs=[
                pl.BlockSpec((TM, K_pad), lambda i: (i, 0)),        # patches tile
                pl.BlockSpec((K_pad, hid_pad), lambda i: (0, 0)),   # weight, resident
                pl.BlockSpec((1, hid_pad), lambda i: (0, 0)),       # bias, resident
            ],
            out_specs=pl.BlockSpec((TM, hid_pad), lambda i: (i, 0)),
        ),
        compiler_params=pltpu.CompilerParams(**cp_kwargs),
        cost_estimate=pl.CostEstimate(
            flops=2 * grid_m * TM * K_pad * hid_pad,
            transcendentals=0,
            bytes_accessed=bytes_accessed,
        ),
    )(patches, w_mat, b_mat)

    # Strip padding only when it exists; reshape to (B, N, hid).
    if M_arr != M or hid_pad != hid:
        out = out[:M, :hid]
    return out.reshape(B, N, hid)


if __name__ == "__main__":
    # Module config (small): image_size=16, patch_size=4, hid_size=32, in_c=3
    image_size, patch_size, hid_size, in_c = 16, 4, 32, 3
    B = 2

    key = jax.random.PRNGKey(0)
    kx, kw, kb = jax.random.split(key, 3)
    x = jax.random.normal(kx, (B, in_c, image_size, image_size), dtype=jnp.float32)
    # Deterministic synthetic params; shapes match nn.Conv2d(in_c, hid, P, P).
    weight = 0.02 * jax.random.normal(
        kw, (hid_size, in_c, patch_size, patch_size), dtype=jnp.float32
    )
    bias = 0.01 * jax.random.normal(kb, (hid_size,), dtype=jnp.float32)

    out = jax.block_until_ready(patch_embed(x, weight, bias, patch_size))

    # Cross-check against a plain-JAX conv reference (same semantics as PyTorch).
    ref = jax.lax.conv_general_dilated(
        x, weight,
        window_strides=(patch_size, patch_size),
        padding="VALID",
        dimension_numbers=("NCHW", "OIHW", "NCHW"),
        precision=jax.lax.Precision.HIGHEST,
    ) + bias.reshape(1, -1, 1, 1)
    ref = ref.reshape(B, hid_size, -1).transpose(0, 2, 1)  # (B, N, hid)

    N = (image_size // patch_size) ** 2
    assert out.shape == (B, N, hid_size)
    assert out.dtype == x.dtype
    # bf16 MXU inputs with f32 accumulation -> slightly looser tolerance.
    assert jnp.allclose(out, ref, atol=2e-2, rtol=2e-2)

    # f32-compute path for callers that need exact Conv2d parity.
    out_f32 = jax.block_until_ready(
        patch_embed(x, weight, bias, patch_size, compute_dtype=jnp.float32)
    )
    assert jnp.allclose(out_f32, ref, atol=1e-4, rtol=1e-3)

    print("KERNEL_OK")
</pallas_src>

<mosaic_0001>
module attributes {stable_mosaic.version = 11 : i64} {
  func.func @_patch_embed_kernel(%arg0: i32, %arg1: memref<16x128xbf16, #tpu.memory_space<vmem>>, %arg2: memref<128x128xbf16, #tpu.memory_space<vmem>>, %arg3: memref<1x128xf32, #tpu.memory_space<vmem>>, %arg4: memref<16x128xf32, #tpu.memory_space<vmem>>) attributes {dimension_semantics = [#tpu.dimension_semantics<parallel>], iteration_bounds = array<i64: 2>, scalar_prefetch = 0 : i64, scratch_operands = 0 : i64, tpu.core_type = #tpu.core_type<tc>, window_params = [{transform_indices = @transform_0, window_bounds = array<i64: 16, 128>}, {pipeline_mode = #tpu.pipeline_mode<synchronous>, transform_indices = @transform_1, window_bounds = array<i64: 128, 128>}, {pipeline_mode = #tpu.pipeline_mode<synchronous>, transform_indices = @transform_2, window_bounds = array<i64: 1, 128>}, {transform_indices = @transform_3, window_bounds = array<i64: 16, 128>}]} {
    %c0 = arith.constant 0 : index
    %c0_0 = arith.constant 0 : index
    %0 = vector.load %arg1[%c0, %c0_0] : memref<16x128xbf16, #tpu.memory_space<vmem>>, vector<16x128xbf16>
    %c0_1 = arith.constant 0 : index
    %c0_2 = arith.constant 0 : index
    %1 = vector.load %arg2[%c0_1, %c0_2] : memref<128x128xbf16, #tpu.memory_space<vmem>>, vector<128x128xbf16>
    %cst = arith.constant dense<0.000000e+00> : vector<16x128xf32>
    %2 = tpu.matmul %0, %1, %cst {dimension_numbers = #tpu.dot_dimension_numbers<[1], [0], [0], [1], [0, 0, 1, 1], [], []>} : vector<16x128xbf16>, vector<128x128xbf16>, vector<16x128xf32> -> vector<16x128xf32>
    %c0_3 = arith.constant 0 : index
    %c0_4 = arith.constant 0 : index
    %3 = vector.load %arg3[%c0_3, %c0_4] : memref<1x128xf32, #tpu.memory_space<vmem>>, vector<1x128xf32>
    %4 = vector.broadcast %3 : vector<1x128xf32> to vector<16x128xf32>
    %5 = arith.addf %2, %4 : vector<16x128xf32>
    %c0_5 = arith.constant 0 : index
    %c0_6 = arith.constant 0 : index
    %6 = vector.load %arg4[%c0_5, %c0_6] : memref<16x128xf32, #tpu.memory_space<vmem>>, vector<16x128xf32>
    tpu.vector_store %arg4[%c0_5, %c0_6], %5 {strides = array<i32>} : memref<16x128xf32, #tpu.memory_space<vmem>>, vector<16x128xf32>,
    return
  }
  func.func @transform_0(%arg0: i32) -> (i32, i32) {
    %c0_i32 = arith.constant 0 : i32
    %c0_i32_0 = arith.constant 0 : i32
    return %arg0, %c0_i32 : i32, i32
  }
  func.func @transform_1(%arg0: i32) -> (i32, i32) {
    %c0_i32 = arith.constant 0 : i32
    %c0_i32_0 = arith.constant 0 : i32
    %c0_i32_1 = arith.constant 0 : i32
    return %c0_i32, %c0_i32_0 : i32, i32
  }
  func.func @transform_2(%arg0: i32) -> (i32, i32) {
    %c0_i32 = arith.constant 0 : i32
    %c0_i32_0 = arith.constant 0 : i32
    %c0_i32_1 = arith.constant 0 : i32
    return %c0_i32, %c0_i32_0 : i32, i32
  }
  func.func @transform_3(%arg0: i32) -> (i32, i32) {
    %c0_i32 = arith.constant 0 : i32
    %c0_i32_0 = arith.constant 0 : i32
    return %arg0, %c0_i32 : i32, i32
  }
}

</mosaic_0001>

<bundles_post_ra>
// kernel: tpu_custom_call.1
= control target key start
LH: loop header
LB: loop body
LE: loop exit
PB: predicated region body
PF: predicated region fallthrough
CT: control target
= control target key end

     0   :  { %8 = vsyncpa [#allocation3], 0  ;;  %s831_s0 = inlined_call_operand.hbm [shape: bf16[32,128], index: 0, kind: input, shape index: {}]   ;;  %s832_s1 = inlined_call_operand.hbm [shape: bf16[128,128], index: 1, kind: input, shape index: {}]   ;;  %s833_s2 = inlined_call_operand.vmem [shape: f32[1,128], index: 2, kind: input, shape index: {}]   ;;  %s834_s3 = inlined_call_operand.hbm [shape: f32[32,128], index: 3, kind: output, shape index: {}]  }
   0x1   :  { %10 = vsyncpa [#allocation3 + $0x1], 0 }
   0x2   :  { %11 = vsyncpa [#allocation6], 0 }
   0x3   :  { %12 = vsyncpa [#allocation4], 0 }
   0x4   :  { %14 = vsyncpa [#allocation4 + $0x1], 0  ;;  %s683_s12 = smov 0   ;;  %s685_s13 = smov 0  }
   0x5   :  { %s687_s14 = smov 0   ;;  %s689_s15 = smov 0  }
   0x6 LB: > { %s704_s16 = sadd.s32 4294967295, %s656_s15   ;;  %s401_s17 = sadd.s32 4294967294, %s656_s15   ;;  %s656_s15 = sphi %s689_s15, %s844_s15   ;;  %s652_s14 = sphi %s687_s14, %s843_s14   ;;  %s648_s13 = sphi %s685_s13, %s842_s13   ;;  %s644_s12 = sphi %s683_s12, %s841_s12  }
   0x7   : > { %p40_p0 = scmp.ne.s32.totalorder %s648_s13, %s644_s12  ;;  %p41_p1 = scmp.eq.s32.totalorder %s704_s16, 0 }
   0x8   : > { %p106_p2 = scmp.eq.s32.totalorder %s704_s16, 1  ;;  %p112_p3 = scmp.eq.s32.totalorder %s401_s17, 1 }
   0x9   : > { %p713_p4 = por %p41_p1, %p40_p0  ;;  %p402_p5 = scmp.ge.s32.totalorder %s656_s15, 1 }
   0xa   : > { %p718_p6 = por %p112_p3, %p40_p0  ;;  %p119_p7 = scmp.lt.s32.totalorder %s656_s15, 3 }
   0xb   : > { %s130_s22 = sshll.u32 %s832_s1, 4  ;;  %s658_s24 = smov [#allocation5]   ;;  %s131_s22 = int_to_ptr.hbm [resolvable:$true] %s130_s22 }
   0xc   : > { %p726_p8 = pnand %p402_p5, %p119_p7  ;;  %s132_s25 = sshll.u32 %s658_s24, 4  ;;  %s133_s25 = int_to_ptr.vmem [resolvable:$true] %s132_s25 }
   0xd   : > { %s736_s26 = sadd.s32 1, %s656_s15   ;;  %s659_s27 = smov 64  }
   0xe   : > { %p472_p9 = pneg %p726_p8  ;;  %s660_s28 = smov 4  }
   0xf   : > { %s24_s29 = ssub.s32 %s656_s15, %s736_s26  ;;  %s27_s30 = sadd.s32 1, %s652_s14 }
  0x10   : > { %p473_p10 = pnand %p472_p9, %p41_p1  ;;  %p25_p12 = scmp.eq.s32.totalorder %s24_s29, 0 }
  0x11   : > { %p34_p13 = scmp.ne.s32.totalorder %s652_s14, %s648_s13  ;;  %p35_p0 = scmp.eq.s32.totalorder %s656_s15, 0 }
  0x12   : > { %475 = dma.hbm_to_vmem [thread:$0]  (!%p473_p10), %s131_s22, 1024, %s133_s25, [#allocation6], %s659_s27, %s659_s27, %s660_s28  }
  0x13   : > { %s748_s4 = scalar_select %p25_p12, %s652_s14, %s27_s30  }
  0x14   : > { %p752_p3 = por %p106_p2, %p34_p13  ;;  %p485_p5 = scmp.lt.s32.totalorder %s656_s15, 2 }
  0x15   : > { %s149_s6 = sand.u32 1, %s652_s14   ;;  %s453_s7 = sshll.u32 %s656_s15, 3 }
  0x16   : > { %p36_p7 = por %p35_p0, %p34_p13  ;;  %s405_s8 = sshll.u32 %s149_s6, 3 }
  0x17   : > { %s158_s11 = scalar_lea.hbm %s831_s0, %s453_s7  ;;  %s153_s20 = scalar_lea.vmem [#allocation2], %s405_s8 }
  0x18   : > { %s159_s17 = sshll.u32 %s158_s11, 4  ;;  %s161_s21 = sshll.u32 %s153_s20, 4  ;;  %s160_s17 = int_to_ptr.hbm [resolvable:$true] %s159_s17  ;;  %s162_s21 = int_to_ptr.vmem [resolvable:$true] %s161_s21 }
  0x19   : > { %p762_p9 = pnand %p485_p5, %p36_p7  ;;  %s150_s24 = scalar_lea.sflag [#allocation3], %s149_s6 }
  0x1a   : > { %s556_s25 = sshra.s32 %s160_s17, 4  ;;  %s563_s8 = scalar_lea.hbm %s831_s0, 16  ;;  %s557_s25 = int_to_ptr.hbm [resolvable:$true] %s556_s25 }
  0x1b   : > { %s558_s29 = scalar_lea.hbm %s557_s25, 8  ;;  %p560_p10 = pneg %p762_p9 }
  0x1c   : > { %p559_p2 = scmp.ne.s32.totalorder %s557_s25, %s558_s29  ;;  %p564_p0 = scmp.lt.s32.totalorder %s557_s25, %s831_s0 }
  0x1d   : > { %p565_p5 = scmp.lt.s32.totalorder %s563_s8, %s558_s29 }
  0x1e   : > { %p561_p12 = pnand %p560_p10, %p559_p2 }
  0x1f   : > { %p566_p7 = por %p565_p5, %p564_p0 }
  0x20   : > { %p562_p13 = pneg %p561_p12 }
  0x22   : > { %p567_p11 = pnand %p566_p7, %p562_p13 }
  0x24   : > { %570 = shalt.err (!%p567_p11)
}
  0x25   : > { %479 = dma.hbm_to_vmem [thread:$0]  (!%p762_p9), %s160_s17, 128, %s162_s21, %s150_s24, %s659_s27, %s659_s27, %s660_s28  }
  0x26   : > { %173 = sbr.rel (%p726_p8) target bundleno = 218 (0xda), region = 32  ;;  %s782_s6 = sand.u32 (!%p726_p8), 1, %s648_s13  }
  0x27   : > { %s409_s11 = sshll.u32 (!%p726_p8), %s782_s6, 3  ;;  %s176_s20 = scalar_lea.sflag (!%p726_p8), [#allocation3], %s782_s6 }
  0x28   : > { %s179_s25 = scalar_lea.vmem (!%p726_p8), [#allocation2], %s409_s11 }
  0x2b   : > { %631 = dma.done.wait (%p713_p4), %s176_s20, 128  }
  0x2c   : > { %633 = vsyncadd (%p713_p4), %s176_s20, 4294967168 }
  0x2d   : > { %635 = dma.done.wait (%p41_p1), [#allocation6], 1024  }
  0x2e   : > { %637 = vsyncadd (%p41_p1), [#allocation6], 4294966272  ;;  %v462_v0 = vld [vmem:[#allocation5 + $0x38] sm:$0xff]  ;;  %v461_v1 = vld [vmem:[#allocation5 + $0x30] sm:$0xff]  ;;  %s411_s18 = sshll.u32 %s782_s6, 4  ;;  %s463_s28 = sshll.u32 %s704_s16, 4 }
  0x2f   : > { %286 = vmatpush.bf16.msra.mxu0 %v462_v0  ;;  %v460_v2 = vld [vmem:[#allocation5 + $0x28] sm:$0xff]  ;;  %v459_v3 = vld [vmem:[#allocation5 + $0x20] sm:$0xff]  ;;  %v458_v4 = vld [vmem:[#allocation5 + $0x18] sm:$0xff]  ;;  %s314_s22 = scalar_lea.hbm %s834_s3, %s463_s28  ;;  %s207_s24 = scalar_lea.vmem [#allocation7], %s411_s18 }
  0x30   : > { %v457_v5 = vld [vmem:[#allocation5 + $0x10] sm:$0xff]  ;;  %v456_v6 = vld [vmem:[#allocation5 + $0x8] sm:$0xff]  ;;  %v455_v7 = vld [vmem:[#allocation5] sm:$0xff]  ;;  %s315_s29 = sshll.u32 %s207_s24, 4  ;;  %s317_s30 = sshll.u32 %s314_s22, 4  ;;  %s316_s29 = int_to_ptr.vmem [resolvable:$true] %s315_s29  ;;  %s318_s30 = int_to_ptr.hbm [resolvable:$true] %s317_s30 }
  0x31   : > { %v454_v8 = vld [vmem:[%s179_s25] sm:$0xff]  ;;  %s303_s7 = scalar_lea.sflag [#allocation4], %s782_s6  ;;  %s600_s8 = sshra.s32 %s318_s30, 4  ;;  %s601_s8 = int_to_ptr.hbm [resolvable:$true] %s600_s8 }
  0x32   : > { %v525_v9 = vld [vmem:[%s833_s2] ss:$0 sm:$0xff]  ;;  %s602_s16 = scalar_lea.hbm %s601_s8, 16  ;;  %s606_s11 = scalar_lea.hbm %s834_s3, 32 }
  0x33   : > { %287 = vmatpush.bf16.msra.mxu0 %v461_v1  ;;  %p603_p1 = scmp.ne.s32.totalorder %s601_s8, %s602_s16  ;;  %p607_p11 = scmp.lt.s32.totalorder %s601_s8, %s834_s3 }
  0x34   : > { %p608_p9 = scmp.lt.s32.totalorder %s606_s11, %s602_s16 }
  0x35   : > { %p604_p4 = pnand %p603_p1, %p752_p3 }
  0x36   : > { %p609_p2 = por %p608_p9, %p607_p11 }
  0x37   : > { %288 = vmatpush.bf16.msra.mxu0 %v460_v2  ;;  %p605_p8 = pneg %p604_p4 }
  0x39   : > { %p610_p10 = pnand %p609_p2, %p605_p8 }
  0x3b   : > { %289 = vmatpush.bf16.msra.mxu0 %v459_v3 }
  0x3f   : > { %290 = vmatpush.bf16.msra.mxu0 %v458_v4 }
  0x43   : > { %291 = vmatpush.bf16.msra.mxu0 %v457_v5 }
  0x47   : > { %292 = vmatpush.bf16.msra.mxu0 %v456_v6 }
  0x4b   : > { %293 = vmatpush.bf16.msra.mxu0 %v455_v7 }
  0x4e   : > { %294 = vmatmul.bf16.vlgmr.msra.gmra.mxu0 %v454_v8 }
  0xcb   : > { %v295_v10 = vpop.f32.mrf.mxu0 }
  0xcc   : > { %v296_v11 = vadd.f32 %v525_v9, %v295_v10 }
  0xce   : > { %300 = vst [vmem:[%s207_s24] sm:$0xff] %v296_v11 }
  0xd3   : > { %v297_v12 = vpop.f32.mrf.mxu0 }
  0xd4   : > { %v298_v13 = vadd.f32 %v525_v9, %v297_v12 }
  0xd6   : > { %301 = vst [vmem:[%s207_s24 + $0x8] sm:$0xff] %v298_v13 }
  0xd7   : > { %613 = shalt.err (!%p610_p10)
}
  0xd8   : > { %s661_s6 = smov 128   ;;  %s662_s18 = smov 8  }
  0xd9   : > { %470 = dma.vmem_to_hbm [thread:$0]  (%p752_p3), %s316_s29, 256, %s318_s30, %s303_s7, %s661_s6, %s661_s6, %s662_s18  }
  0xda PF: > { %s332_s23 = sand.u32 1, %s644_s12   ;;  %p840_p12 = scmp.ge.s32.totalorder %s656_s15, 2 }
  0xdb   : > { %s333_s27 = scalar_lea.sflag [#allocation4], %s332_s23 }
  0xdc   : > { %p481_p13 = pnand %p840_p12, %p718_p6 }
  0xde   : > { %p482_p0 = pneg %p481_p13 }
  0xe0   : > { %639 = dma.done.wait (%p482_p0), %s333_s27, 256  }
  0xe1   : > { %641 = vsyncadd (%p482_p0), %s333_s27, 4294967040  ;;  %p17_p5 = scmp.ge.s32.totalorder %s736_s26, 4   ;;  %s841_s12 = smov %s648_s13 }
  0xe2   : > { %s842_s13 = smov %s652_s14  ;;  %s843_s14 = smov %s748_s4 }
  0xe3   : > { %s844_s15 = smov %s736_s26  ;;  %19 = sbr.rel (!%p17_p5) target bundleno = 6 (0x6), region = 81 }
  0xe8   :  { %339 = vsyncpa [#allocation3], 1 }
  0xe9   :  { %341 = vsyncpa [#allocation3 + $0x1], 1 }
  0xea   :  { %342 = vsyncpa [#allocation6], 1 }
  0xeb   :  { %343 = vsyncpa [#allocation4], 1 }
  0xec   :  { %345 = vsyncpa [#allocation4 + $0x1], 1 }

</bundles_post_ra>
